<compile_context>
chip_gen: v7x
topology: tpu7x:2x2x1
jax: 0.10.0
libtpu: 0.0.40
codegen_flags: <defaults>
</compile_context>

<pallas_src>
import math

import jax
import jax.numpy as jnp
from jax.experimental import pallas as pl
from jax.experimental.pallas import tpu as pltpu


_LANE = 128
_MAX_COLS = 2048  # lane-dim cap: keeps row-bytes modest, well past 85%-roofline tile size


def _copy_kernel(x_ref, o_ref):
    # Pure data movement: the reshape itself is shape metadata (handled in the
    # wrapper); the kernel streams lane-dense tiles through VMEM, which is all
    # the hardware work a contiguous view() implies.
    o_ref[...] = x_ref[...]


def _resolve_shape(total, shape):
    """torch.view-style target-shape resolution (a single -1 is allowed)."""
    shape = tuple(int(s) for s in shape)
    if shape.count(-1) > 1:
        raise ValueError("only one -1 allowed in shape")
    known = 1
    for s in shape:
        if s != -1:
            known *= s
    if -1 in shape:
        if known == 0 or total % known != 0:
            raise ValueError(f"cannot reshape {total} elements into {shape}")
        shape = tuple(total // known if s == -1 else s for s in shape)
    if math.prod(shape) != total:
        raise ValueError(f"cannot reshape {total} elements into {shape}")
    return shape


def _vmem_limit_bytes():
    """3/4 of physical VMEM: ~48 MiB on v7x (64 MiB), ~96 MiB on v5e/v6e (128 MiB)."""
    cap = None
    try:
        cap = getattr(pltpu.get_tpu_info(), "vmem_capacity_bytes", None)
    except Exception:
        cap = None
    if not cap:
        cap = 64 * 1024 * 1024  # conservative fallback (v7x-sized)
    return max(16 * 1024 * 1024, (int(cap) * 3) // 4)


def _is_multi_tensorcore_chip():
    """Best-effort: chips whose grid is sharded across >1 TensorCore."""
    try:
        kind = jax.devices()[0].device_kind.lower()
    except Exception:
        return False
    return any(tag in kind for tag in ("v7", "7x", "v4", "v5p"))


def _pick_slab(batch, flat):
    """Pick a lane-dense 2D view (rows, cols) of the whole flattened buffer."""
    total = batch * flat
    if total % _LANE == 0:
        best = None
        for k in range(_MAX_COLS // _LANE, 0, -1):
            cols = _LANE * k
            if total % cols == 0:
                if total // cols >= 8:
                    return total // cols, cols  # largest lane-dense cols with >=8 rows
                if best is None:
                    best = cols
        return total // best, best
    # Not lane-divisible: keep the (batch, flat) layout; the sub-128 / ragged
    # column tail uses masked stores, which is unavoidable without a pad copy.
    return batch, flat


def _pick_tiles(rows, cols, itemsize, vmem_limit, tile_rows=None):
    """Fixed few-MiB 2D tiles; ragged edges handled by cdiv grids."""
    pack = max(8, 32 // itemsize)  # sublane packing: 8 (f32), 16 (bf16), 32 (int8/fp8)

    # Lane tile: full width when it is lane-dense, else a 2048-lane ragged tile.
    if cols % _LANE == 0:
        tc = min(cols, _MAX_COLS)
    elif cols > _MAX_COLS:
        tc = _MAX_COLS            # multiple of 128; last column block is ragged
    else:
        tc = cols                 # equal to full dim -> always legal

    # Row tile: biggest multiple of `pack` whose 4 double-buffered copies
    # (2 in + 2 out) fit in half the VMEM limit (headroom for compiler scratch).
    per_tile = vmem_limit // 8
    tr = (per_tile // max(1, tc * itemsize)) // pack * pack
    tr = max(pack, tr)
    if rows <= pack:
        tr = rows                 # full-dim block (always legal)
    else:
        tr = min(tr, (rows // pack) * pack)

    if tile_rows is not None and rows > pack:   # testing / tuning override
        tr = min(tr, max(pack, (tile_rows // pack) * pack))

    # On multi-TC chips make sure the 'parallel' grid has >=2 steps so both
    # cores' DMA paths participate; skipped on single-TC v5e/v6e.
    if (_is_multi_tensorcore_chip()
            and rows >= 2 * pack
            and pl.cdiv(rows, tr) * pl.cdiv(cols, tc) == 1):
        tr = pack * pl.cdiv(pl.cdiv(rows, 2), pack)

    return tr, tc


def reshape_forward(x, shape, *, tile_rows=None):
    """Pallas equivalent of Reshape(*shape).forward(x) == x.view(x.size(0), *shape)."""
    batch = x.shape[0]
    flat = math.prod(x.shape[1:]) if x.ndim > 1 else 1
    target = _resolve_shape(flat, shape)
    out_shape = (batch,) + target

    total = batch * flat
    if total == 0:
        # Nothing to copy; the view is pure metadata.
        return jnp.reshape(x, out_shape)

    itemsize = jnp.dtype(x.dtype).itemsize
    rows, cols = _pick_slab(batch, flat)
    vmem_limit = _vmem_limit_bytes()
    tr, tc = _pick_tiles(rows, cols, itemsize, vmem_limit, tile_rows)
    grid = (pl.cdiv(rows, tr), pl.cdiv(cols, tc))

    # Metadata-only flatten for contiguous row-major data.
    x2 = x.reshape(rows, cols)

    out2 = pl.pallas_call(
        _copy_kernel,
        out_shape=jax.ShapeDtypeStruct((rows, cols), x.dtype),
        grid=grid,
        in_specs=[pl.BlockSpec((tr, tc), lambda i, j: (i, j))],
        out_specs=pl.BlockSpec((tr, tc), lambda i, j: (i, j)),
        compiler_params=pltpu.CompilerParams(
            dimension_semantics=("parallel", "parallel"),
            vmem_limit_bytes=vmem_limit,
        ),
        cost_estimate=pl.CostEstimate(
            flops=0,
            transcendentals=0,
            bytes_accessed=2 * total * itemsize,
        ),
    )(x2)

    # The view itself is pure shape metadata; apply it outside the kernel.
    return out2.reshape(out_shape)


if __name__ == "__main__":
    k0, k1, k2, k3 = jax.random.split(jax.random.PRNGKey(0), 4)

    ok = True

    def _check(out, ref, tag):
        global ok
        if out.shape != ref.shape or not bool(jnp.array_equal(out, ref)):
            ok = False
            print(f"MISMATCH [{tag}]: got {out.shape}, want {ref.shape}")

    # Main input: lane-dense path (flat = 1024, total = 2048).
    B, C, H, W = 2, 4, 16, 16
    x = jax.random.normal(k0, (B, C, H, W), dtype=jnp.float32)
    for shape in [(-1,), (8, 128), (4, -1), (C, H, W)]:
        out = jax.block_until_ready(reshape_forward(x, shape))
        ref = jnp.reshape(x, (B,) + _resolve_shape(C * H * W, shape))
        _check(out, ref, f"f32 {shape}")

    # Non-lane-divisible fallback path (flat = 105, total = 210).
    xb = jax.random.normal(k1, (2, 3, 5, 7), dtype=jnp.float32)
    outb = jax.block_until_ready(reshape_forward(xb, (15, 7)))
    _check(outb, jnp.reshape(xb, (2, 15, 7)), "f32 fallback (15,7)")

    # Multi-step ragged grid (rows=25 -> 3 full row-blocks of 8 + ragged 1).
    xc = jax.random.normal(k2, (200, 4, 8, 8), dtype=jnp.float32)
    outc = jax.block_until_ready(reshape_forward(xc, (-1,), tile_rows=8))
    _check(outc, jnp.reshape(xc, (200, 256)), "f32 multi-step")

    # bf16 sublane-packing path.
    xd = jax.random.normal(k3, (4, 8, 16, 16), dtype=jnp.bfloat16)
    outd = jax.block_until_ready(reshape_forward(xd, (8, -1)))
    _check(outd, jnp.reshape(xd, (4, 8, 256)), "bf16 (8,-1)")

    if ok:
        print("KERNEL_OK")
</pallas_src>

<mosaic_0001>
module attributes {stable_mosaic.version = 11 : i64} {
  func.func @_copy_kernel(%arg0: i32, %arg1: i32, %arg2: memref<8x256xf32, #tpu.memory_space<vmem>>, %arg3: memref<8x256xf32, #tpu.memory_space<vmem>>) attributes {dimension_semantics = [#tpu.dimension_semantics<parallel>, #tpu.dimension_semantics<parallel>], iteration_bounds = array<i64: 1, 1>, scalar_prefetch = 0 : i64, scratch_operands = 0 : i64, tpu.core_type = #tpu.core_type<tc>, window_params = [{transform_indices = @transform_0, window_bounds = array<i64: 8, 256>}, {transform_indices = @transform_1, window_bounds = array<i64: 8, 256>}]} {
    %c0 = arith.constant 0 : index
    %c0_0 = arith.constant 0 : index
    %0 = vector.load %arg2[%c0, %c0_0] : memref<8x256xf32, #tpu.memory_space<vmem>>, vector<8x256xf32>
    %c0_1 = arith.constant 0 : index
    %c0_2 = arith.constant 0 : index
    %1 = vector.load %arg3[%c0_1, %c0_2] : memref<8x256xf32, #tpu.memory_space<vmem>>, vector<8x256xf32>
    tpu.vector_store %arg3[%c0_1, %c0_2], %0 {strides = array<i32>} : memref<8x256xf32, #tpu.memory_space<vmem>>, vector<8x256xf32>,
    return
  }
  func.func @transform_0(%arg0: i32, %arg1: i32) -> (i32, i32) {
    %c0_i32 = arith.constant 0 : i32
    return %arg0, %arg1 : i32, i32
  }
  func.func @transform_1(%arg0: i32, %arg1: i32) -> (i32, i32) {
    %c0_i32 = arith.constant 0 : i32
    return %arg0, %arg1 : i32, i32
  }
}

</mosaic_0001>

<bundles_post_ra>
// kernel: tpu_custom_call.1
= control target key start
LH: loop header
LB: loop body
LE: loop exit
PB: predicated region body
PF: predicated region fallthrough
CT: control target
= control target key end

     0   :  { %6 = vsyncpa [#allocation3], 0  ;;  %s126_s0 = inlined_call_operand.hbm [shape: f32[8,256], index: 0, kind: input, shape index: {}]   ;;  %s127_s1 = inlined_call_operand.hbm [shape: f32[8,256], index: 1, kind: output, shape index: {}]  }
   0x1   :  { %7 = vsyncpa [#allocation4], 0  ;;  %s90_s6 = smov [#allocation2]   ;;  %s42_s10 = scalar_lea.hbm %s126_s0, 256 }
   0x2   :  { %s14_s7 = sshll.u32 %s90_s6, 4  ;;  %p43_p0 = scmp.ne.s32.totalorder %s126_s0, %s42_s10  ;;  %s15_s7 = int_to_ptr.vmem [resolvable:$true] %s14_s7 }
   0x3   :  { %p46_p1 = scmp.lt.u32.totalorder %s42_s10, %s126_s0 }
   0x5   :  { %p48_p2 = pnand %p46_p1, %p43_p0 }
   0x7   :  { %51 = shalt.err (!%p48_p2)
}
   0x8   :  { %s52_s15 = scalar_lea.vmem %s15_s7, 256  ;;  %p57_p4 = scmp.lt.s32.totalorder %s15_s7, %s15_s7 }
   0x9   :  { %p53_p3 = scmp.ne.s32.totalorder %s15_s7, %s52_s15  ;;  %p58_p5 = scmp.lt.s32.totalorder %s52_s15, %s52_s15 }
   0xb   :  { %p59_p6 = por %p58_p5, %p57_p4 }
   0xd   :  { %p60_p7 = pnand %p59_p6, %p53_p3 }
   0xf   :  { %63 = shalt.err (!%p60_p7)
}
  0x10   :  { %17 = dma.hbm_to_vmem [thread:$0]  %s126_s0, 256, %s15_s7, [#allocation3]  }
  0x11   :  { %86 = dma.done.wait [#allocation3], 256  }
  0x12   :  { %87 = vsyncadd [#allocation3], 4294967040  ;;  %s91_s18 = smov [#allocation5]   ;;  %v21_v0 = vld [vmem:[#allocation2] sm:$0xff]  ;;  %v22_v1 = vld [vmem:[#allocation2 + $0x8] sm:$0xff] }
  0x13   :  { %s31_s19 = sshll.u32 %s91_s18, 4  ;;  %23 = vst [vmem:[#allocation5] sm:$0xff] %v21_v0  ;;  %24 = vst [vmem:[#allocation5 + $0x8] sm:$0xff] %v22_v1  ;;  %s32_s19 = int_to_ptr.vmem [resolvable:$true] %s31_s19 }
  0x14   :  { %s64_s20 = scalar_lea.vmem %s32_s19, 256  ;;  %p69_p9 = scmp.lt.s32.totalorder %s32_s19, %s32_s19 }
  0x15   :  { %p65_p8 = scmp.ne.s32.totalorder %s32_s19, %s64_s20  ;;  %p70_p10 = scmp.lt.s32.totalorder %s64_s20, %s64_s20 }
  0x17   :  { %p71_p11 = por %p70_p10, %p69_p9 }
  0x19   :  { %p72_p12 = pnand %p71_p11, %p65_p8 }
  0x1b   :  { %75 = shalt.err (!%p72_p12)
}
  0x1c   :  { %s76_s0 = scalar_lea.hbm %s127_s1, 256 }
  0x1d   :  { %p77_p13 = scmp.ne.s32.totalorder %s127_s1, %s76_s0  ;;  %p80_p0 = scmp.lt.u32.totalorder %s76_s0, %s127_s1 }
  0x1f   :  { %p82_p1 = pnand %p80_p0, %p77_p13 }
  0x21   :  { %85 = shalt.err (!%p82_p1)
}
  0x22   :  { %34 = dma.vmem_to_hbm [thread:$0]  %s32_s19, 256, %s127_s1, [#allocation4]  }
  0x23   :  { %88 = dma.done.wait [#allocation4], 256  }
  0x24   :  { %89 = vsyncadd [#allocation4], 4294967040 }
  0x25   :  { %38 = vsyncpa [#allocation3], 1 }
  0x26   :  { %39 = vsyncpa [#allocation4], 1 }

</bundles_post_ra>
